<compile_context>
chip_gen: v7x
topology: tpu7x:2x2x1
jax: 0.10.0
libtpu: 0.0.40
codegen_flags: <defaults>
</compile_context>

<pallas_src>
import math

import numpy as np

import jax
import jax.numpy as jnp
from jax import lax
from jax.experimental import pallas as pl
from jax.experimental.pallas import tpu as pltpu

# ----- model hyperparameters (small, consistent with the module) -----
B = 2          # batch
S = 8          # sequence length
D_MODEL = 32   # d_model
N_HEADS = 4    # n_heads
D_K = 8        # d_k
D_V = 8        # d_v
D_FF = 64      # d_ff
N_LAYERS = 6   # n_layers (encoder stack depth)
LN_EPS = 1e-5  # PyTorch nn.LayerNorm default

T = B * S      # tokens: batch folded into rows for every dense matmul


# --------------------------------------------------------------------------
# Fused encoder-stack kernel: L x (QKV -> attention -> out-proj -> +res -> LN
#                                   -> FFN), all in one kernel invocation.
# --------------------------------------------------------------------------
def bert_encoder_stack_kernel(x_ref, bias_ref,
                              wqkv_ref, bqkv_ref, wo_ref, bo_ref,
                              gamma_ref, beta_ref,
                              w1_ref, b1_ref, w2_ref, b2_ref,
                              packed_ref, attn_ref):
    n_layers = wqkv_ref.shape[0]                 # static (from the ref shape)
    x = x_ref[...]                               # (T, D) = (16, 32)
    bias = bias_ref[...]                         # (T, T) additive mask bias
    scale = 1.0 / math.sqrt(D_K)
    hdk = N_HEADS * D_K

    # Statically unrolled layer loop (L is tiny and static): straight-line code
    # with static weight indices; per-iteration live state is a few vregs.
    for l in range(n_layers):
        # fused QKV projection: one MXU push, one bias broadcast
        qkv = jnp.dot(x, wqkv_ref[l],
                      preferred_element_type=jnp.float32) + bqkv_ref[l]  # (T, 96)

        # heads stay on lanes: per-head 2-D matmuls on the flat token axis,
        # batch separation via the block-diagonal -1e9 bias (cross-batch
        # probabilities underflow to exactly 0 after the row-max subtraction).
        ctx_heads, attn_heads = [], []
        for h in range(N_HEADS):
            q_h = qkv[:, h * D_K:(h + 1) * D_K] * scale            # (T, Dk)
            k_h = qkv[:, hdk + h * D_K: hdk + (h + 1) * D_K]       # (T, Dk)
            v_h = qkv[:, 2 * hdk + h * D_V: 2 * hdk + (h + 1) * D_V]

            s_h = lax.dot_general(q_h, k_h, (((1,), (1,)), ((), ())),
                                  preferred_element_type=jnp.float32) + bias  # (T, T)
            s_h = s_h - jnp.max(s_h, axis=-1, keepdims=True)
            p_h = jnp.exp(s_h)
            a_h = p_h / jnp.sum(p_h, axis=-1, keepdims=True)        # (T, T)

            ctx_heads.append(jnp.dot(a_h, v_h,
                                     preferred_element_type=jnp.float32))  # (T, Dv)
            attn_heads.append(a_h)

        context = jnp.concatenate(ctx_heads, axis=-1)    # (T, H*Dv) == merged heads
        attn_all = jnp.concatenate(attn_heads, axis=-1)  # (T, H*T)

        # output projection + residual + LayerNorm
        out = jnp.dot(context, wo_ref[l],
                      preferred_element_type=jnp.float32) + bo_ref[l]     # (T, D)
        y = out + x
        mean = jnp.mean(y, axis=-1, keepdims=True)
        var = jnp.mean((y - mean) ** 2, axis=-1, keepdims=True)
        att_out = (y - mean) * lax.rsqrt(var + LN_EPS) * gamma_ref[l] + beta_ref[l]

        # position-wise FFN: fc1 -> exact-erf gelu -> fc2 (next layer's input)
        h1 = jnp.dot(att_out, w1_ref[l],
                     preferred_element_type=jnp.float32) + b1_ref[l]      # (T, D_FF)
        g1 = h1 * 0.5 * (1.0 + lax.erf(h1 * (1.0 / math.sqrt(2.0))))
        x = jnp.dot(g1, w2_ref[l],
                    preferred_element_type=jnp.float32) + b2_ref[l]       # (T, D)

    # One lane-dense (T, 4*D) = (16, 128) store for the four (T, 32) results,
    # plus one (T, H*T) = (16, 64) slab for the last layer's attention probs.
    packed_ref[...] = jnp.concatenate([x, att_out, out, context], axis=-1)
    attn_ref[...] = attn_all


# --------------------------------------------------------------------------
# Wrapper
# --------------------------------------------------------------------------
_VMEM = pl.BlockSpec(memory_space=pltpu.MemorySpace.VMEM)  # whole array in VMEM


@jax.jit
def encoder_stack(enc_inputs, enc_self_attn_mask, stacked_params):
    """Runs the whole encoder stack (L layers) in one pallas_call.

    Returns (enc_outputs, attention_outputs, attn, attv, attliner) of the LAST
    layer -- exactly what BERT's layer loop yields (and EncoderLayer.forward
    for L=1)."""
    wqkv, bqkv, wo, bo, gamma, beta, w1, b1, w2, b2 = stacked_params

    x2d = enc_inputs.reshape(T, D_MODEL)

    # Additive attention bias (T, T): -1e9 where the key is padded (per the
    # original mask) and -1e9 on all cross-batch (query,key) pairs so the
    # batch can be folded into one token axis inside the kernel.
    neg = jnp.where(enc_self_attn_mask != 0, jnp.float32(-1e9), jnp.float32(0.0))
    bias4 = jnp.full((B, S, B, S), -1e9, jnp.float32)
    bias4 = bias4.at[jnp.arange(B), :, jnp.arange(B), :].set(neg)
    bias_tt = bias4.reshape(T, T)

    out_shapes = (
        jax.ShapeDtypeStruct((T, 4 * D_MODEL), jnp.float32),   # packed lane-dense
        jax.ShapeDtypeStruct((T, N_HEADS * T), jnp.float32),   # attn slab
    )

    packed, attn_all = pl.pallas_call(
        bert_encoder_stack_kernel,
        out_shape=out_shapes,
        in_specs=[_VMEM] * 12,
        out_specs=tuple([_VMEM] * 2),
    )(x2d, bias_tt, wqkv, bqkv, wo, bo, gamma, beta, w1, b1, w2, b2)

    # Un-pack the lane-dense output (free layout plumbing in XLA).
    enc      = packed[:, 0 * D_MODEL:1 * D_MODEL].reshape(B, S, D_MODEL)
    att_out  = packed[:, 1 * D_MODEL:2 * D_MODEL].reshape(B, S, D_MODEL)
    attliner = packed[:, 2 * D_MODEL:3 * D_MODEL].reshape(B, S, D_MODEL)
    attv = (packed[:, 3 * D_MODEL:4 * D_MODEL]
            .reshape(B, S, N_HEADS, D_V).transpose(0, 2, 1, 3))           # (B,H,S,Dv)

    # Extract the valid (same-batch) blocks of the attention slab.
    a5 = attn_all.reshape(B, S, N_HEADS, B, S)
    attn = a5[jnp.arange(B), :, :, jnp.arange(B), :].transpose(0, 2, 1, 3)  # (B,H,S,S)

    return enc, att_out, attn, attv, attliner


# --------------------------------------------------------------------------
# Deterministic parameter init (per layer, mirroring the torch modules) and
# host-side stacking/fusion of the per-layer weights (free, outside the kernel)
# --------------------------------------------------------------------------
def init_layer_params(key):
    ks = jax.random.split(key, 12)

    def lin(kw, kb, fan_in, fan_out):
        w = jax.random.normal(kw, (fan_in, fan_out), jnp.float32) * (1.0 / math.sqrt(fan_in))
        b = jax.random.normal(kb, (1, fan_out), jnp.float32) * 0.02
        return w, b

    wq, bq = lin(ks[0], ks[1], D_MODEL, N_HEADS * D_K)
    wk, bk = lin(ks[2], ks[3], D_MODEL, N_HEADS * D_K)
    wv, bv = lin(ks[4], ks[5], D_MODEL, N_HEADS * D_V)
    wo, bo = lin(ks[6], ks[7], N_HEADS * D_V, D_MODEL)
    gamma = jnp.ones((1, D_MODEL), jnp.float32)   # LayerNorm weight
    beta = jnp.zeros((1, D_MODEL), jnp.float32)   # LayerNorm bias
    w1, b1 = lin(ks[8], ks[9], D_MODEL, D_FF)
    w2, b2 = lin(ks[10], ks[11], D_FF, D_MODEL)
    return (wq, bq, wk, bk, wv, bv, wo, bo, gamma, beta), (w1, b1, w2, b2)


def stack_layer_params(per_layer):
    """Fuse Wq|Wk|Wv per layer and stack every parameter on a leading L axis."""
    def st(fn):
        return jnp.stack([fn(ap, fp) for ap, fp in per_layer], axis=0)

    wqkv = st(lambda ap, fp: jnp.concatenate([ap[0], ap[2], ap[4]], axis=1))  # (L,D,96)
    bqkv = st(lambda ap, fp: jnp.concatenate([ap[1], ap[3], ap[5]], axis=1))  # (L,1,96)
    wo = st(lambda ap, fp: ap[6]);    bo = st(lambda ap, fp: ap[7])
    gamma = st(lambda ap, fp: ap[8]); beta = st(lambda ap, fp: ap[9])
    w1 = st(lambda ap, fp: fp[0]);    b1 = st(lambda ap, fp: fp[1])
    w2 = st(lambda ap, fp: fp[2]);    b2 = st(lambda ap, fp: fp[3])
    return (wqkv, bqkv, wo, bo, gamma, beta, w1, b1, w2, b2)


# --------------------------------------------------------------------------
# Pure numpy (float64) reference, looped over layers
# --------------------------------------------------------------------------
def _reference(x, mask, per_layer_params):
    x = np.asarray(x, np.float64)
    m = np.asarray(mask)
    erf = np.vectorize(math.erf)
    enc = att_out = attn = ctx = out = None

    for attn_p, ffn_p in per_layer_params:
        wq, bq, wk, bk, wv, bv, wo, bo, gamma, beta = [
            np.asarray(a, np.float64) for a in attn_p]
        w1, b1, w2, b2 = [np.asarray(a, np.float64) for a in ffn_p]

        x2 = x.reshape(T, D_MODEL)
        q = x2 @ wq + bq
        k = x2 @ wk + bk
        v = x2 @ wv + bv

        def heads(t, dh):
            return t.reshape(B, S, N_HEADS, dh).transpose(0, 2, 1, 3)   # (B,H,S,dh)

        qh, kh, vh = heads(q, D_K), heads(k, D_K), heads(v, D_V)
        scores = qh @ kh.transpose(0, 1, 3, 2) / math.sqrt(D_K)
        scores = np.where(m[:, None, :, :] != 0, -1e9, scores)
        scores = scores - scores.max(-1, keepdims=True)
        p = np.exp(scores)
        attn = p / p.sum(-1, keepdims=True)
        ctx = attn @ vh                                                  # (B,H,S,Dv)
        ctx_t = ctx.transpose(0, 2, 1, 3).reshape(T, N_HEADS * D_V)
        out = ctx_t @ wo + bo
        y = out + x2
        mean = y.mean(-1, keepdims=True)
        var = ((y - mean) ** 2).mean(-1, keepdims=True)
        att_out = (y - mean) / np.sqrt(var + LN_EPS) * gamma + beta
        h1 = att_out @ w1 + b1
        g1 = h1 * 0.5 * (1.0 + erf(h1 / math.sqrt(2.0)))
        enc = g1 @ w2 + b2
        x = enc.reshape(B, S, D_MODEL)

    return (enc.reshape(B, S, D_MODEL),
            att_out.reshape(B, S, D_MODEL),
            attn,
            ctx,
            out.reshape(B, S, D_MODEL))


# --------------------------------------------------------------------------
# Example run
# --------------------------------------------------------------------------
if __name__ == "__main__":
    key = jax.random.PRNGKey(0)
    k_x, k_p = jax.random.split(key)

    enc_inputs = jax.random.normal(k_x, (B, S, D_MODEL), jnp.float32)

    # padding-style self-attention mask (nonzero = masked key position), like
    # get_attn_pad_mask: batch element 1 pads its last 2 key positions.
    key_pad = jnp.array([[0] * S, [0] * (S - 2) + [1, 1]], dtype=jnp.int32)   # (B, S)
    enc_self_attn_mask = jnp.broadcast_to(key_pad[:, None, :], (B, S, S)).astype(jnp.int32)

    per_layer = [init_layer_params(k) for k in jax.random.split(k_p, N_LAYERS)]

    # ---- tight per-layer correctness check (L=1 == EncoderLayer.forward) ----
    outs1 = jax.block_until_ready(
        encoder_stack(enc_inputs, enc_self_attn_mask, stack_layer_params(per_layer[:1])))
    ref1 = _reference(enc_inputs, enc_self_attn_mask, per_layer[:1])
    for got, want in zip(outs1, ref1):
        np.testing.assert_allclose(np.asarray(got), want, rtol=5e-2, atol=5e-2)

    # ---- fused L-layer stack: one pallas_call for the whole encoder ----
    outs = jax.block_until_ready(
        encoder_stack(enc_inputs, enc_self_attn_mask, stack_layer_params(per_layer)))
    enc_outputs, attention_outputs, attn, attv, attliner = outs
    assert enc_outputs.shape == (B, S, D_MODEL)
    assert attention_outputs.shape == (B, S, D_MODEL)
    assert attn.shape == (B, N_HEADS, S, S)
    assert attv.shape == (B, N_HEADS, S, D_V)
    assert attliner.shape == (B, S, D_MODEL)

    # coarse wiring check for the deep stack (deliberately loose: tolerant of
    # TPU MXU f32 precision-mode drift compounded over N_LAYERS; the per-layer
    # math is tightly checked above at L=1).
    ref = _reference(enc_inputs, enc_self_attn_mask, per_layer)
    for got, want in zip(outs, ref):
        np.testing.assert_allclose(np.asarray(got), want, rtol=2.5e-1, atol=2.5e-1)

    print("KERNEL_OK")
</pallas_src>

<mosaic_0001>
module attributes {stable_mosaic.version = 11 : i64} {
  func.func @bert_encoder_stack_kernel(%arg0: memref<16x32xf32, #tpu.memory_space<vmem>>, %arg1: memref<16x16xf32, #tpu.memory_space<vmem>>, %arg2: memref<1x32x96xf32, #tpu.memory_space<vmem>>, %arg3: memref<1x1x96xf32, #tpu.memory_space<vmem>>, %arg4: memref<1x32x32xf32, #tpu.memory_space<vmem>>, %arg5: memref<1x1x32xf32, #tpu.memory_space<vmem>>, %arg6: memref<1x1x32xf32, #tpu.memory_space<vmem>>, %arg7: memref<1x1x32xf32, #tpu.memory_space<vmem>>, %arg8: memref<1x32x64xf32, #tpu.memory_space<vmem>>, %arg9: memref<1x1x64xf32, #tpu.memory_space<vmem>>, %arg10: memref<1x64x32xf32, #tpu.memory_space<vmem>>, %arg11: memref<1x1x32xf32, #tpu.memory_space<vmem>>, %arg12: memref<16x128xf32, #tpu.memory_space<vmem>>, %arg13: memref<16x64xf32, #tpu.memory_space<vmem>>) attributes {dimension_semantics = [], scalar_prefetch = 0 : i64, scratch_operands = 0 : i64, tpu.core_type = #tpu.core_type<tc>} {
    %c0 = arith.constant 0 : index
    %c0_0 = arith.constant 0 : index
    %0 = vector.load %arg0[%c0, %c0_0] : memref<16x32xf32, #tpu.memory_space<vmem>>, vector<16x32xf32>
    %c0_1 = arith.constant 0 : index
    %c0_2 = arith.constant 0 : index
    %1 = vector.load %arg1[%c0_1, %c0_2] : memref<16x16xf32, #tpu.memory_space<vmem>>, vector<16x16xf32>
    %c0_3 = arith.constant 0 : index
    %c0_4 = arith.constant 0 : index
    %c0_5 = arith.constant 0 : index
    %2 = vector.load %arg2[%c0_3, %c0_4, %c0_5] : memref<1x32x96xf32, #tpu.memory_space<vmem>>, vector<1x32x96xf32>
    %3 = vector.shape_cast %2 : vector<1x32x96xf32> to vector<32x96xf32>
    %cst = arith.constant dense<0.000000e+00> : vector<16x96xf32>
    %4 = tpu.matmul %0, %3, %cst {dimension_numbers = #tpu.dot_dimension_numbers<[1], [0], [0], [1], [0, 0, 1, 1], [], []>} : vector<16x32xf32>, vector<32x96xf32>, vector<16x96xf32> -> vector<16x96xf32>
    %c0_6 = arith.constant 0 : index
    %c0_7 = arith.constant 0 : index
    %c0_8 = arith.constant 0 : index
    %5 = vector.load %arg3[%c0_6, %c0_7, %c0_8] : memref<1x1x96xf32, #tpu.memory_space<vmem>>, vector<1x1x96xf32>
    %6 = vector.shape_cast %5 : vector<1x1x96xf32> to vector<1x96xf32>
    %7 = vector.broadcast %6 : vector<1x96xf32> to vector<16x96xf32>
    %8 = arith.addf %4, %7 : vector<16x96xf32>
    %9 = vector.extract_strided_slice %8 {offsets = [0, 0], sizes = [16, 8], strides = [1, 1]} : vector<16x96xf32> to vector<16x8xf32>
    %cst_9 = arith.constant 0.353553385 : f32
    %10 = vector.broadcast %cst_9 : f32 to vector<16x8xf32>
    %11 = arith.mulf %9, %10 : vector<16x8xf32>
    %12 = vector.extract_strided_slice %8 {offsets = [0, 32], sizes = [16, 8], strides = [1, 1]} : vector<16x96xf32> to vector<16x8xf32>
    %13 = vector.extract_strided_slice %8 {offsets = [0, 64], sizes = [16, 8], strides = [1, 1]} : vector<16x96xf32> to vector<16x8xf32>
    %cst_10 = arith.constant dense<0.000000e+00> : vector<16x16xf32>
    %14 = tpu.matmul %11, %12, %cst_10 {dimension_numbers = #tpu.dot_dimension_numbers<[1], [1], [0], [0], [0, 0, 1, 0], [], []>} : vector<16x8xf32>, vector<16x8xf32>, vector<16x16xf32> -> vector<16x16xf32>
    %15 = arith.addf %14, %1 : vector<16x16xf32>
    %cst_11 = arith.constant dense<0xFF800000> : vector<16xf32>
    %16 = vector.multi_reduction <maximumf>, %15, %cst_11 [1] : vector<16x16xf32> to vector<16xf32>
    %17 = vector.shape_cast %16 : vector<16xf32> to vector<16x1xf32>
    %18 = vector.broadcast %17 : vector<16x1xf32> to vector<16x16xf32>
    %19 = arith.subf %15, %18 : vector<16x16xf32>
    %20 = math.exp %19 : vector<16x16xf32>
    %cst_12 = arith.constant dense<0.000000e+00> : vector<16xf32>
    %21 = vector.multi_reduction <add>, %20, %cst_12 [1] : vector<16x16xf32> to vector<16xf32>
    %22 = vector.shape_cast %21 : vector<16xf32> to vector<16x1xf32>
    %23 = vector.broadcast %22 : vector<16x1xf32> to vector<16x16xf32>
    %24 = arith.divf %20, %23 : vector<16x16xf32>
    %cst_13 = arith.constant dense<0.000000e+00> : vector<16x8xf32>
    %25 = tpu.matmul %24, %13, %cst_13 {dimension_numbers = #tpu.dot_dimension_numbers<[1], [0], [0], [1], [0, 0, 1, 1], [], []>} : vector<16x16xf32>, vector<16x8xf32>, vector<16x8xf32> -> vector<16x8xf32>
    %26 = vector.extract_strided_slice %8 {offsets = [0, 8], sizes = [16, 8], strides = [1, 1]} : vector<16x96xf32> to vector<16x8xf32>
    %cst_14 = arith.constant 0.353553385 : f32
    %27 = vector.broadcast %cst_14 : f32 to vector<16x8xf32>
    %28 = arith.mulf %26, %27 : vector<16x8xf32>
    %29 = vector.extract_strided_slice %8 {offsets = [0, 40], sizes = [16, 8], strides = [1, 1]} : vector<16x96xf32> to vector<16x8xf32>
    %30 = vector.extract_strided_slice %8 {offsets = [0, 72], sizes = [16, 8], strides = [1, 1]} : vector<16x96xf32> to vector<16x8xf32>
    %cst_15 = arith.constant dense<0.000000e+00> : vector<16x16xf32>
    %31 = tpu.matmul %28, %29, %cst_15 {dimension_numbers = #tpu.dot_dimension_numbers<[1], [1], [0], [0], [0, 0, 1, 0], [], []>} : vector<16x8xf32>, vector<16x8xf32>, vector<16x16xf32> -> vector<16x16xf32>
    %32 = arith.addf %31, %1 : vector<16x16xf32>
    %cst_16 = arith.constant dense<0xFF800000> : vector<16xf32>
    %33 = vector.multi_reduction <maximumf>, %32, %cst_16 [1] : vector<16x16xf32> to vector<16xf32>
    %34 = vector.shape_cast %33 : vector<16xf32> to vector<16x1xf32>
    %35 = vector.broadcast %34 : vector<16x1xf32> to vector<16x16xf32>
    %36 = arith.subf %32, %35 : vector<16x16xf32>
    %37 = math.exp %36 : vector<16x16xf32>
    %cst_17 = arith.constant dense<0.000000e+00> : vector<16xf32>
    %38 = vector.multi_reduction <add>, %37, %cst_17 [1] : vector<16x16xf32> to vector<16xf32>
    %39 = vector.shape_cast %38 : vector<16xf32> to vector<16x1xf32>
    %40 = vector.broadcast %39 : vector<16x1xf32> to vector<16x16xf32>
    %41 = arith.divf %37, %40 : vector<16x16xf32>
    %cst_18 = arith.constant dense<0.000000e+00> : vector<16x8xf32>
    %42 = tpu.matmul %41, %30, %cst_18 {dimension_numbers = #tpu.dot_dimension_numbers<[1], [0], [0], [1], [0, 0, 1, 1], [], []>} : vector<16x16xf32>, vector<16x8xf32>, vector<16x8xf32> -> vector<16x8xf32>
    %43 = vector.extract_strided_slice %8 {offsets = [0, 16], sizes = [16, 8], strides = [1, 1]} : vector<16x96xf32> to vector<16x8xf32>
    %cst_19 = arith.constant 0.353553385 : f32
    %44 = vector.broadcast %cst_19 : f32 to vector<16x8xf32>
    %45 = arith.mulf %43, %44 : vector<16x8xf32>
    %46 = vector.extract_strided_slice %8 {offsets = [0, 48], sizes = [16, 8], strides = [1, 1]} : vector<16x96xf32> to vector<16x8xf32>
    %47 = vector.extract_strided_slice %8 {offsets = [0, 80], sizes = [16, 8], strides = [1, 1]} : vector<16x96xf32> to vector<16x8xf32>
    %cst_20 = arith.constant dense<0.000000e+00> : vector<16x16xf32>
    %48 = tpu.matmul %45, %46, %cst_20 {dimension_numbers = #tpu.dot_dimension_numbers<[1], [1], [0], [0], [0, 0, 1, 0], [], []>} : vector<16x8xf32>, vector<16x8xf32>, vector<16x16xf32> -> vector<16x16xf32>
    %49 = arith.addf %48, %1 : vector<16x16xf32>
    %cst_21 = arith.constant dense<0xFF800000> : vector<16xf32>
    %50 = vector.multi_reduction <maximumf>, %49, %cst_21 [1] : vector<16x16xf32> to vector<16xf32>
    %51 = vector.shape_cast %50 : vector<16xf32> to vector<16x1xf32>
    %52 = vector.broadcast %51 : vector<16x1xf32> to vector<16x16xf32>
    %53 = arith.subf %49, %52 : vector<16x16xf32>
    %54 = math.exp %53 : vector<16x16xf32>
    %cst_22 = arith.constant dense<0.000000e+00> : vector<16xf32>
    %55 = vector.multi_reduction <add>, %54, %cst_22 [1] : vector<16x16xf32> to vector<16xf32>
    %56 = vector.shape_cast %55 : vector<16xf32> to vector<16x1xf32>
    %57 = vector.broadcast %56 : vector<16x1xf32> to vector<16x16xf32>
    %58 = arith.divf %54, %57 : vector<16x16xf32>
    %cst_23 = arith.constant dense<0.000000e+00> : vector<16x8xf32>
    %59 = tpu.matmul %58, %47, %cst_23 {dimension_numbers = #tpu.dot_dimension_numbers<[1], [0], [0], [1], [0, 0, 1, 1], [], []>} : vector<16x16xf32>, vector<16x8xf32>, vector<16x8xf32> -> vector<16x8xf32>
    %60 = vector.extract_strided_slice %8 {offsets = [0, 24], sizes = [16, 8], strides = [1, 1]} : vector<16x96xf32> to vector<16x8xf32>
    %cst_24 = arith.constant 0.353553385 : f32
    %61 = vector.broadcast %cst_24 : f32 to vector<16x8xf32>
    %62 = arith.mulf %60, %61 : vector<16x8xf32>
    %63 = vector.extract_strided_slice %8 {offsets = [0, 56], sizes = [16, 8], strides = [1, 1]} : vector<16x96xf32> to vector<16x8xf32>
    %64 = vector.extract_strided_slice %8 {offsets = [0, 88], sizes = [16, 8], strides = [1, 1]} : vector<16x96xf32> to vector<16x8xf32>
    %cst_25 = arith.constant dense<0.000000e+00> : vector<16x16xf32>
    %65 = tpu.matmul %62, %63, %cst_25 {dimension_numbers = #tpu.dot_dimension_numbers<[1], [1], [0], [0], [0, 0, 1, 0], [], []>} : vector<16x8xf32>, vector<16x8xf32>, vector<16x16xf32> -> vector<16x16xf32>
    %66 = arith.addf %65, %1 : vector<16x16xf32>
    %cst_26 = arith.constant dense<0xFF800000> : vector<16xf32>
    %67 = vector.multi_reduction <maximumf>, %66, %cst_26 [1] : vector<16x16xf32> to vector<16xf32>
    %68 = vector.shape_cast %67 : vector<16xf32> to vector<16x1xf32>
    %69 = vector.broadcast %68 : vector<16x1xf32> to vector<16x16xf32>
    %70 = arith.subf %66, %69 : vector<16x16xf32>
    %71 = math.exp %70 : vector<16x16xf32>
    %cst_27 = arith.constant dense<0.000000e+00> : vector<16xf32>
    %72 = vector.multi_reduction <add>, %71, %cst_27 [1] : vector<16x16xf32> to vector<16xf32>
    %73 = vector.shape_cast %72 : vector<16xf32> to vector<16x1xf32>
    %74 = vector.broadcast %73 : vector<16x1xf32> to vector<16x16xf32>
    %75 = arith.divf %71, %74 : vector<16x16xf32>
    %cst_28 = arith.constant dense<0.000000e+00> : vector<16x8xf32>
    %76 = tpu.matmul %75, %64, %cst_28 {dimension_numbers = #tpu.dot_dimension_numbers<[1], [0], [0], [1], [0, 0, 1, 1], [], []>} : vector<16x16xf32>, vector<16x8xf32>, vector<16x8xf32> -> vector<16x8xf32>
    %77 = tpu.concatenate %25, %42, %59, %76 in 1 : vector<16x8xf32>, vector<16x8xf32>, vector<16x8xf32>, vector<16x8xf32> -> vector<16x32xf32>
    %78 = tpu.concatenate %24, %41, %58, %75 in 1 : vector<16x16xf32>, vector<16x16xf32>, vector<16x16xf32>, vector<16x16xf32> -> vector<16x64xf32>
    %c0_29 = arith.constant 0 : index
    %c0_30 = arith.constant 0 : index
    %c0_31 = arith.constant 0 : index
    %79 = vector.load %arg4[%c0_29, %c0_30, %c0_31] : memref<1x32x32xf32, #tpu.memory_space<vmem>>, vector<1x32x32xf32>
    %80 = vector.shape_cast %79 : vector<1x32x32xf32> to vector<32x32xf32>
    %cst_32 = arith.constant dense<0.000000e+00> : vector<16x32xf32>
    %81 = tpu.matmul %77, %80, %cst_32 {dimension_numbers = #tpu.dot_dimension_numbers<[1], [0], [0], [1], [0, 0, 1, 1], [], []>} : vector<16x32xf32>, vector<32x32xf32>, vector<16x32xf32> -> vector<16x32xf32>
    %c0_33 = arith.constant 0 : index
    %c0_34 = arith.constant 0 : index
    %c0_35 = arith.constant 0 : index
    %82 = vector.load %arg5[%c0_33, %c0_34, %c0_35] : memref<1x1x32xf32, #tpu.memory_space<vmem>>, vector<1x1x32xf32>
    %83 = vector.shape_cast %82 : vector<1x1x32xf32> to vector<1x32xf32>
    %84 = vector.broadcast %83 : vector<1x32xf32> to vector<16x32xf32>
    %85 = arith.addf %81, %84 : vector<16x32xf32>
    %86 = arith.addf %85, %0 : vector<16x32xf32>
    %cst_36 = arith.constant dense<0.000000e+00> : vector<16xf32>
    %87 = vector.multi_reduction <add>, %86, %cst_36 [1] : vector<16x32xf32> to vector<16xf32>
    %88 = vector.shape_cast %87 : vector<16xf32> to vector<16x1xf32>
    %cst_37 = arith.constant 3.200000e+01 : f32
    %89 = vector.broadcast %cst_37 : f32 to vector<16x1xf32>
    %90 = arith.divf %88, %89 : vector<16x1xf32>
    %91 = vector.broadcast %90 : vector<16x1xf32> to vector<16x32xf32>
    %92 = arith.subf %86, %91 : vector<16x32xf32>
    %93 = arith.mulf %92, %92 : vector<16x32xf32>
    %cst_38 = arith.constant dense<0.000000e+00> : vector<16xf32>
    %94 = vector.multi_reduction <add>, %93, %cst_38 [1] : vector<16x32xf32> to vector<16xf32>
    %95 = vector.shape_cast %94 : vector<16xf32> to vector<16x1xf32>
    %cst_39 = arith.constant 3.200000e+01 : f32
    %96 = vector.broadcast %cst_39 : f32 to vector<16x1xf32>
    %97 = arith.divf %95, %96 : vector<16x1xf32>
    %98 = vector.broadcast %90 : vector<16x1xf32> to vector<16x32xf32>
    %99 = arith.subf %86, %98 : vector<16x32xf32>
    %cst_40 = arith.constant 9.99999974E-6 : f32
    %100 = vector.broadcast %cst_40 : f32 to vector<16x1xf32>
    %101 = arith.addf %97, %100 : vector<16x1xf32>
    %102 = math.rsqrt %101 : vector<16x1xf32>
    %103 = vector.broadcast %102 : vector<16x1xf32> to vector<16x32xf32>
    %104 = arith.mulf %99, %103 : vector<16x32xf32>
    %c0_41 = arith.constant 0 : index
    %c0_42 = arith.constant 0 : index
    %c0_43 = arith.constant 0 : index
    %105 = vector.load %arg6[%c0_41, %c0_42, %c0_43] : memref<1x1x32xf32, #tpu.memory_space<vmem>>, vector<1x1x32xf32>
    %106 = vector.shape_cast %105 : vector<1x1x32xf32> to vector<1x32xf32>
    %107 = vector.broadcast %106 : vector<1x32xf32> to vector<16x32xf32>
    %108 = arith.mulf %104, %107 : vector<16x32xf32>
    %c0_44 = arith.constant 0 : index
    %c0_45 = arith.constant 0 : index
    %c0_46 = arith.constant 0 : index
    %109 = vector.load %arg7[%c0_44, %c0_45, %c0_46] : memref<1x1x32xf32, #tpu.memory_space<vmem>>, vector<1x1x32xf32>
    %110 = vector.shape_cast %109 : vector<1x1x32xf32> to vector<1x32xf32>
    %111 = vector.broadcast %110 : vector<1x32xf32> to vector<16x32xf32>
    %112 = arith.addf %108, %111 : vector<16x32xf32>
    %c0_47 = arith.constant 0 : index
    %c0_48 = arith.constant 0 : index
    %c0_49 = arith.constant 0 : index
    %113 = vector.load %arg8[%c0_47, %c0_48, %c0_49] : memref<1x32x64xf32, #tpu.memory_space<vmem>>, vector<1x32x64xf32>
    %114 = vector.shape_cast %113 : vector<1x32x64xf32> to vector<32x64xf32>
    %cst_50 = arith.constant dense<0.000000e+00> : vector<16x64xf32>
    %115 = tpu.matmul %112, %114, %cst_50 {dimension_numbers = #tpu.dot_dimension_numbers<[1], [0], [0], [1], [0, 0, 1, 1], [], []>} : vector<16x32xf32>, vector<32x64xf32>, vector<16x64xf32> -> vector<16x64xf32>
    %c0_51 = arith.constant 0 : index
    %c0_52 = arith.constant 0 : index
    %c0_53 = arith.constant 0 : index
    %116 = vector.load %arg9[%c0_51, %c0_52, %c0_53] : memref<1x1x64xf32, #tpu.memory_space<vmem>>, vector<1x1x64xf32>
    %117 = vector.shape_cast %116 : vector<1x1x64xf32> to vector<1x64xf32>
    %118 = vector.broadcast %117 : vector<1x64xf32> to vector<16x64xf32>
    %119 = arith.addf %115, %118 : vector<16x64xf32>
    %cst_54 = arith.constant 5.000000e-01 : f32
    %120 = vector.broadcast %cst_54 : f32 to vector<16x64xf32>
    %121 = arith.mulf %119, %120 : vector<16x64xf32>
    %cst_55 = arith.constant 0.707106769 : f32
    %122 = vector.broadcast %cst_55 : f32 to vector<16x64xf32>
    %123 = arith.mulf %119, %122 : vector<16x64xf32>
    %124 = math.erf %123 : vector<16x64xf32>
    %cst_56 = arith.constant 1.000000e+00 : f32
    %125 = vector.broadcast %cst_56 : f32 to vector<16x64xf32>
    %126 = arith.addf %125, %124 : vector<16x64xf32>
    %127 = arith.mulf %121, %126 : vector<16x64xf32>
    %c0_57 = arith.constant 0 : index
    %c0_58 = arith.constant 0 : index
    %c0_59 = arith.constant 0 : index
    %128 = vector.load %arg10[%c0_57, %c0_58, %c0_59] : memref<1x64x32xf32, #tpu.memory_space<vmem>>, vector<1x64x32xf32>
    %129 = vector.shape_cast %128 : vector<1x64x32xf32> to vector<64x32xf32>
    %cst_60 = arith.constant dense<0.000000e+00> : vector<16x32xf32>
    %130 = tpu.matmul %127, %129, %cst_60 {dimension_numbers = #tpu.dot_dimension_numbers<[1], [0], [0], [1], [0, 0, 1, 1], [], []>} : vector<16x64xf32>, vector<64x32xf32>, vector<16x32xf32> -> vector<16x32xf32>
    %c0_61 = arith.constant 0 : index
    %c0_62 = arith.constant 0 : index
    %c0_63 = arith.constant 0 : index
    %131 = vector.load %arg11[%c0_61, %c0_62, %c0_63] : memref<1x1x32xf32, #tpu.memory_space<vmem>>, vector<1x1x32xf32>
    %132 = vector.shape_cast %131 : vector<1x1x32xf32> to vector<1x32xf32>
    %133 = vector.broadcast %132 : vector<1x32xf32> to vector<16x32xf32>
    %134 = arith.addf %130, %133 : vector<16x32xf32>
    %135 = tpu.concatenate %134, %112, %85, %77 in 1 : vector<16x32xf32>, vector<16x32xf32>, vector<16x32xf32>, vector<16x32xf32> -> vector<16x128xf32>
    %c0_64 = arith.constant 0 : index
    %c0_65 = arith.constant 0 : index
    %136 = vector.load %arg12[%c0_64, %c0_65] : memref<16x128xf32, #tpu.memory_space<vmem>>, vector<16x128xf32>
    tpu.vector_store %arg12[%c0_64, %c0_65], %135 {strides = array<i32>} : memref<16x128xf32, #tpu.memory_space<vmem>>, vector<16x128xf32>,
    %c0_66 = arith.constant 0 : index
    %c0_67 = arith.constant 0 : index
    %137 = vector.load %arg13[%c0_66, %c0_67] : memref<16x64xf32, #tpu.memory_space<vmem>>, vector<16x64xf32>
    tpu.vector_store %arg13[%c0_66, %c0_67], %78 {strides = array<i32>} : memref<16x64xf32, #tpu.memory_space<vmem>>, vector<16x64xf32>,
    return
  }
}

</mosaic_0001>

<bundles_post_ra>
// kernel: encoder_stack.1
= control target key start
LH: loop header
LB: loop body
LE: loop exit
PB: predicated region body
PF: predicated region fallthrough
CT: control target
= control target key end

     0   :  { %vm58_vm0 = vcmask 261120   ;;  %vm148_vm1 = vcmask 64512   ;;  %s1758_s21 = smov 96   ;;  %vm234_vm3 = vcmask 130048   ;;  %s1762_s26 = smov 80   ;;  %vm972_vm4 = vcmask 195584   ;;  %s2136_s2 = inlined_call_operand.vmem [shape: f32[1,32,96], index: 2, kind: input, shape index: {}]   ;;  %s2137_s0 = inlined_call_operand.vmem [shape: f32[16,32], index: 0, kind: input, shape index: {}]   ;;  %s2138_s3 = inlined_call_operand.vmem [shape: f32[1,1,96], index: 3, kind: input, shape index: {}]   ;;  %s2139_s1 = inlined_call_operand.vmem [shape: f32[16,16], index: 1, kind: input, shape index: {}]   ;;  %s2140_s4 = inlined_call_operand.vmem [shape: f32[1,32,32], index: 4, kind: input, shape index: {}]   ;;  %s2141_s5 = inlined_call_operand.vmem [shape: f32[1,1,32], index: 5, kind: input, shape index: {}]   ;;  %s2142_s8 = inlined_call_operand.vmem [shape: f32[1,32,64], index: 8, kind: input, shape index: {}]   ;;  %s2143_s13 = inlined_call_operand.vmem [shape: f32[16,64], index: 13, kind: output, shape index: {1}]   ;;  %s2144_s6 = inlined_call_operand.vmem [shape: f32[1,1,32], index: 6, kind: input, shape index: {}]   ;;  %s2145_s7 = inlined_call_operand.vmem [shape: f32[1,1,32], index: 7, kind: input, shape index: {}]   ;;  %s2146_s10 = inlined_call_operand.vmem [shape: f32[1,64,32], index: 10, kind: input, shape index: {}]   ;;  %s2147_s9 = inlined_call_operand.vmem [shape: f32[1,1,64], index: 9, kind: input, shape index: {}]   ;;  %s2148_s11 = inlined_call_operand.vmem [shape: f32[1,1,32], index: 11, kind: input, shape index: {}]   ;;  %s2149_s12 = inlined_call_operand.vmem [shape: f32[16,128], index: 12, kind: output, shape index: {0}]  }
   0x1   :  { %v47_v0 = vld [vmem:[%s2136_s2] sm:$0xff]  ;;  %v48_v1 = vld [vmem:[%s2136_s2 + $0x8] sm:$0xff]  ;;  %v49_v2 = vld [vmem:[%s2136_s2 + $0x10] sm:$0xff]  ;;  %s1763_s27 = smov 56   ;;  %s1764_s28 = smov 112   ;;  %vm997_vm5 = vcmask 392192  }
   0x2   :  { %v1583_v3 = vpack.c.bf16 %v48_v1, %v47_v0  ;;  %v50_v4 = vld [vmem:[%s2136_s2 + $0x18] sm:$0xff]  ;;  %v1858_v5 = vld [vmem:[%s2137_s0] sm:$0xff]  ;;  %v1865_v7 = vld [vmem:[%s2137_s0 + $0x8] sm:$0xff]  ;;  %s1759_s0 = smov 120   ;;  %s1765_s29 = smov 72   ;;  %vm1256_vm6 = vcmask 523264  }
   0x3   :  { %v1587_v6 = vpack.c.bf16 %v50_v4, %v49_v2  ;;  %1483 = vmatprep.mubr.msk.f32.mxu1 %vm58_vm0, %v1858_v5  ;;  %v1377_v8 = vld [vmem:[%s2138_s3] ss:$0 sm:$0xff]  ;;  %s1760_s3 = smov 88   ;;  %vm1887_vm2 = vmpackc.low %vm148_vm1, %vm148_vm1  ;;  %v1906_v27 = vld [vmem:[%s2139_s1 + $0x8] sm:$0xff]  ;;  %s1766_s30 = smov 104   ;;  %vm1362_vm7 = vcmask 785408  }
   0x4   :  { %1584 = vmatprep.subr.bf16.mxu1 %v1583_v3  ;;  %v1911_v28 = vld [vmem:[%s2139_s1] sm:$0xff]  ;;  %s1761_s1 = smov 64   ;;  %s1767_s14 = smov 48  }
   0x5   :  { %1586 = vmatpush3.bf16.msra.mxu1 %v1583_v3  ;;  %s1768_s15 = smov 8   ;;  %s1769_s16 = smov 40  }
   0x6   :  { %1588 = vmatprep.subr.bf16.mxu1 %v1587_v6  ;;  %s1770_s17 = smov 16   ;;  %s1771_s24 = smov 24  }
   0x9   :  { %1590 = vmatpush3.bf16.msra.mxu1 %v1587_v6 }
   0xc   :  { %1484 = vmatmul.mubr.msk.f32.vlgmr.msra.gmra.mrb[0].mxu1 %vm58_vm0, %v1865_v7 }
  0xdf   :  { %v1485_v9 = vpop.f32.mrb[0].mxu1 }
  0xe0   :  { %v137_v10 = vadd.f32 %v1485_v9, %v1377_v8  ;;  %v131_v11 = vpop.f32.mrb[1].mxu1 }
  0xe1   :  { %v132_v12 = vadd.f32 %v1377_v8, %v131_v11 }
  0xe2   :  { %v1881_v15 = vmul.f32 0.35355338, %v137_v10 }
  0xe3   :  { %v1872_v13 = vpack.i.bf16 %v137_v10, %v132_v12  ;;  %v1874_v14 = vmul.f32 0.35355338, %v132_v12 }
  0xe5   :  { %1679 = vrot.lane.b32.xlu0 %v1872_v13, %s1758_s21  ;;  %344 = vrot.lane.b32.xlu1 %v1874_v14, %s1759_s0 }
  0xe6   :  { %1490 = vmatprep.mubr.msk.f32.mxu1 %vm148_vm1, %v1874_v14 }
  0xe9   :  { %1684 = vrot.lane.b32.xlu0 %v1872_v13, %s1760_s3  ;;  %346 = vrot.lane.b32.xlu1 %v1881_v15, %s1759_s0 }
 0x157   :  { %v1680_v16 = vpop.permute.xlu0 %1679  ;;  %v345_v25 = vpop.permute.xlu1 %344 }
 0x158   :  { %v1682_v17 = vunpack.i.h.bf16 %v1680_v16  ;;  %v1681_v18 = vunpack.i.l.bf16 %v1680_v16 }
 0x15a   :  { %v1591_v20 = vpack.c.bf16 %v1682_v17, %v1681_v18 }
 0x15b   :  { %v1685_v21 = vpop.permute.xlu0 %1684  ;;  %v347_v26 = vpop.permute.xlu1 %346 }
 0x15c   :  { %v1687_v22 = vunpack.i.h.bf16 %v1685_v21  ;;  %v1686_v23 = vunpack.i.l.bf16 %v1685_v21  ;;  %1593 = vmatprep.subr.msk.bf16.mxu1 %vm1887_vm2, %v1591_v20 }
 0x15d   :  { %1596 = vmatpush3.bf16.xpose.msk.msra.mxu1 %vm1887_vm2, %v1591_v20 }
 0x15e   :  { %v1601_v24 = vpack.c.bf16 %v1687_v22, %v1686_v23 }
 0x160   :  { %1603 = vmatprep.subr.msk.bf16.mxu1 %vm1887_vm2, %v1601_v24 }
 0x164   :  { %1491 = vmatmul.mubr.msk.f32.vlgmr.msra.gmra.mrb[2].mxu1 %vm148_vm1, %v1881_v15 }
 0x165   :  { %1606 = vmatpush3.bf16.xpose.msk.msra.mxu1 %vm1887_vm2, %v1601_v24  ;;  %1504 = vmatprep.mubr.msk.f32.mxu1 %vm148_vm1, %v345_v25 }
 0x16c   :  { %1505 = vmatmul.mubr.msk.f32.vlgmr.msra.gmra.mrb[4].mxu1 %vm148_vm1, %v347_v26 }
 0x237   :  { %v1492_v29 = vpop.f32.mrb[2].mxu1 }
 0x238   :  { %v231_v30 = vadd.f32 %v1492_v29, %v1906_v27  ;;  %v225_v31 = vpop.f32.mrb[3].mxu1 }
 0x239   :  { %v226_v32 = vadd.f32 %v225_v31, %v1911_v28 }
 0x23a   :  { %v238_v33 = vsel %vm234_vm3, %v231_v30, -inf }
 0x23b   :  { %239 = vmax.xlane.f32.xlu1 %v238_v33  ;;  %v235_v34 = vsel %vm234_vm3, %v226_v32, -inf }
 0x23c   :  { %236 = vmax.xlane.f32.xlu0 %v235_v34 }
 0x23f   :  { %v1506_v35 = vpop.f32.mrb[4].mxu1 }
 0x240   :  { %v426_v36 = vpop.f32.mrb[5].mxu1  ;;  %v432_v38 = vadd.f32 %v1506_v35, %v1906_v27 }
 0x241   :  { %v427_v37 = vadd.f32 %v426_v36, %v1911_v28 }
 0x242   :  { %v438_v40 = vsel %vm234_vm3, %v432_v38, -inf }
 0x243   :  { %v435_v39 = vsel %vm234_vm3, %v427_v37, -inf }
 0x244   :  { %436 = vmax.xlane.f32.xlu0 %v435_v39 }
 0x248   :  { %439 = vmax.xlane.f32.xlu0 %v438_v40 }
 0x24c   :  { %1689 = vrot.lane.b32.xlu1 %v1872_v13, %s1761_s1 }
 0x2c8   :  { %v240_v41 = vpop.xlane.xlu1 %239 }
 0x2c9   :  { %v242_v42 = vsub.f32 %v231_v30, %v240_v41  ;;  %v237_v43 = vpop.xlane.xlu0 %236 }
 0x2ca   :  { %v241_v44 = vsub.f32 %v226_v32, %v237_v43 }
 0x2cb   :  { %v245_v45 = vmul.f32 1.442695, %v242_v42 }
 0x2cc   :  { %v243_v46 = vmul.f32 1.442695, %v241_v44  ;;  %v1690_v47 = vpop.permute.xlu1 %1689 }
 0x2cd   :  { %1718 = vpow2.f32 %v245_v45  ;;  %v1692_v48 = vunpack.i.h.bf16 %v1690_v47  ;;  %v1691_v49 = vunpack.i.l.bf16 %v1690_v47 }
 0x2ce   :  { %1720 = vpow2.f32 %v243_v46 }
 0x2cf   :  { %v1597_v50 = vpack.c.bf16 %v1692_v48, %v1691_v49 }
 0x2d1   :  { %1598 = vmatprep.subr.bf16.mxu0 %v1597_v50  ;;  %v437_v51 = vpop.xlane.xlu0 %436 }
 0x2d2   :  { %1600 = vmatpush3.bf16.msra.mxu0 %v1597_v50  ;;  %v441_v61 = vsub.f32 %v427_v37, %v437_v51 }
 0x2d4   :  { %v443_v62 = vmul.f32 1.442695, %v441_v61 }
 0x2d5   :  { %v440_v52 = vpop.xlane.xlu0 %439 }
 0x2d6   :  { %v442_v53 = vsub.f32 %v432_v38, %v440_v52 }
 0x2d7   :  { %v1719_v54 = vpop.eup %1718 }
 0x2d8   :  { %v1721_v55 = vpop.eup %1720  ;;  %v445_v56 = vmul.f32 1.442695, %v442_v53  ;;  %v250_v57 = vsel %vm234_vm3, %v1719_v54, 0.0 }
 0x2d9   :  { %251 = vadd.xlane.f32.xlu0 %v250_v57  ;;  %v247_v58 = vsel %vm234_vm3, %v1721_v55, 0.0 }
 0x2da   :  { %1722 = vpow2.f32 %v445_v56  ;;  %248 = vadd.xlane.f32.xlu1 %v247_v58 }
 0x2db   :  { %1724 = vpow2.f32 %v443_v62 }
 0x2e4   :  { %v1723_v59 = vpop.eup %1722 }
 0x2e5   :  { %v450_v60 = vsel %vm234_vm3, %v1723_v59, 0.0  ;;  %v1725_v63 = vpop.eup %1724 }
 0x2e6   :  { %451 = vadd.xlane.f32.xlu0 %v450_v60  ;;  %v447_v0 = vsel %vm234_vm3, %v1725_v63, 0.0 }
 0x2eb   :  { %1699 = vrot.lane.b32.xlu1 %v1872_v13, %s1762_s26  ;;  %s1772_s26 = smov 32  }
 0x2fc   :  { %1694 = vrot.lane.b32.xlu0 %v1872_v13, %s1763_s27 }
 0x300   :  { %546 = vrot.lane.b32.xlu0 %v1881_v15, %s1764_s28 }
 0x30f   :  { %448 = vadd.xlane.f32.xlu1 %v447_v0 }
 0x320   :  { %544 = vrot.lane.b32.xlu1 %v1874_v14, %s1764_s28 }
 0x366   :  { %v252_v1 = vpop.xlane.xlu0 %251 }
 0x367   :  { %1726 = vrcp.f32 %v252_v1  ;;  %v249_v2 = vpop.xlane.xlu1 %248 }
 0x368   :  { %1728 = vrcp.f32 %v249_v2 }
 0x36b   :  { %v1700_v10 = vpop.permute.xlu1 %1699 }
 0x36c   :  { %v1702_v12 = vunpack.i.h.bf16 %v1700_v10  ;;  %v1701_v16 = vunpack.i.l.bf16 %v1700_v10 }
 0x36e   :  { %v1611_v21 = vpack.c.bf16 %v1702_v12, %v1701_v16 }
 0x371   :  { %v1727_v3 = vpop.eup %1726 }
 0x372   :  { %v1729_v4 = vpop.eup %1728  ;;  %v1933_v9 = vmul.f32 %v1727_v3, %v1719_v54 }
 0x373   :  { %v452_v6 = vpop.xlane.xlu0 %451  ;;  %v1931_v8 = vmul.f32 %v1729_v4, %v1721_v55 }
 0x374   :  { %1730 = vrcp.f32 %v452_v6 }
 0x375   :  { %1497 = vmatprep.mubr.msk.f32.mxu0 %vm234_vm3, %v1931_v8 }
 0x376   :  { %1498 = vmatmul.mubr.msk.f32.vlgmr.msra.gmra.mrb[0].mxu0 %vm234_vm3, %v1933_v9 }
 0x377   :  { %v1695_v11 = vpop.permute.xlu0 %1694 }
 0x378   :  { %v1697_v17 = vunpack.i.h.bf16 %v1695_v11  ;;  %v1696_v18 = vunpack.i.l.bf16 %v1695_v11 }
 0x37a   :  { %v1607_v20 = vpack.c.bf16 %v1697_v17, %v1696_v18 }
 0x37b   :  { %v547_v30 = vpop.permute.xlu0 %546 }
 0x37c   :  { %1608 = vmatprep.subr.bf16.mxu0 %v1607_v20 }
 0x37d   :  { %1610 = vmatpush3.bf16.msra.mxu0 %v1607_v20 }
 0x37e   :  { %1613 = vmatprep.subr.msk.bf16.mxu0 %vm1887_vm2, %v1611_v21  ;;  %v1731_v23 = vpop.eup %1730 }
 0x37f   :  { %v1943_v26 = vmul.f32 %v1731_v23, %v1723_v59 }
 0x39c   :  { %v449_v22 = vpop.xlane.xlu1 %448 }
 0x39d   :  { %1732 = vrcp.f32 %v449_v22 }
 0x3a0   :  { %v545_v29 = vpop.permute.xlu1 %544 }
 0x3a7   :  { %v1733_v24 = vpop.eup %1732 }
 0x3a8   :  { %v1941_v25 = vmul.f32 %v1733_v24, %v1725_v63 }
 0x3aa   :  { %1511 = vmatprep.mubr.msk.f32.mxu0 %vm234_vm3, %v1941_v25 }
 0x3ab   :  { %1512 = vmatmul.mubr.msk.f32.vlgmr.msra.gmra.mrb[2].mxu0 %vm234_vm3, %v1943_v26 }
 0x3ac   :  { %1616 = vmatpush3.bf16.xpose.msk.msra.mxu0 %vm1887_vm2, %v1611_v21  ;;  %1518 = vmatprep.mubr.msk.f32.mxu0 %vm148_vm1, %v545_v29 }
 0x3b3   :  { %1519 = vmatmul.mubr.msk.f32.vlgmr.msra.gmra.mrb[4].mxu0 %vm148_vm1, %v547_v30 }
 0x449   :  { %v1953_v31 = vpop.f32.mrb[0].mxu0 }
 0x44a   :  { %v1955_v32 = vpop.f32.mrb[1].mxu0 }
 0x47e   :  { %v1957_v33 = vpop.f32.mrb[2].mxu0 }
 0x47f   :  { %v1959_v34 = vpop.f32.mrb[3].mxu0 }
 0x486   :  { %v1520_v35 = vpop.f32.mrb[4].mxu0 }
 0x487   :  { %v632_v36 = vadd.f32 %v1520_v35, %v1906_v27  ;;  %v626_v37 = vpop.f32.mrb[5].mxu0 }
 0x488   :  { %v627_v38 = vadd.f32 %v626_v37, %v1911_v28 }
 0x489   :  { %v638_v39 = vsel %vm234_vm3, %v632_v36, -inf }
 0x48a   :  { %639 = vmax.xlane.f32.xlu0 %v638_v39  ;;  %v635_v40 = vsel %vm234_vm3, %v627_v38, -inf  ;;  %v1000_v39 = vld [vmem:[%s2140_s4] sm:$0xff] }
 0x48b   :  { %636 = vmax.xlane.f32.xlu1 %v635_v40  ;;  %v1001_v40 = vld [vmem:[%s2140_s4 + $0x8] sm:$0xff] }
 0x517   :  { %v640_v41 = vpop.xlane.xlu0 %639 }
 0x518   :  { %v642_v42 = vsub.f32 %v632_v36, %v640_v41  ;;  %v637_v43 = vpop.xlane.xlu1 %636  ;;  %v1002_v41 = vld [vmem:[%s2140_s4 + $0x10] sm:$0xff] }
 0x519   :  { %v641_v44 = vsub.f32 %v627_v38, %v637_v43  ;;  %v1003_v43 = vld [vmem:[%s2140_s4 + $0x18] sm:$0xff] }
 0x51a   :  { %v645_v45 = vmul.f32 1.442695, %v642_v42  ;;  %v1631_v42 = vpack.c.bf16 %v1001_v40, %v1000_v39  ;;  %v1408_v40 = vld [vmem:[%s2145_s7] ss:$0 sm:$0xff] }
 0x51b   :  { %v643_v46 = vmul.f32 1.442695, %v641_v44  ;;  %v1635_v44 = vpack.c.bf16 %v1003_v43, %v1002_v41 }
 0x51c   :  { %1734 = vpow2.f32 %v645_v45 }
 0x51d   :  { %1736 = vpow2.f32 %v643_v46 }
 0x526   :  { %v1735_v47 = vpop.eup %1734 }
 0x527   :  { %v1737_v48 = vpop.eup %1736  ;;  %v650_v49 = vsel %vm234_vm3, %v1735_v47, 0.0 }
 0x528   :  { %651 = vadd.xlane.f32.xlu1 %v650_v49  ;;  %v647_v50 = vsel %vm234_vm3, %v1737_v48, 0.0 }
 0x529   :  { %648 = vadd.xlane.f32.xlu0 %v647_v50 }
 0x539   :  { %1709 = vrot.lane.b32.xlu1 %v1872_v13, %s1765_s29 }
 0x53d   :  { %744 = vrot.lane.b32.xlu1 %v1874_v14, %s1766_s30 }
 0x53f   :  { %1704 = vrot.lane.b32.xlu0 %v1872_v13, %s1767_s14 }
 0x543   :  { %746 = vrot.lane.b32.xlu0 %v1881_v15, %s1766_s30 }
 0x5b5   :  { %v652_v51 = vpop.xlane.xlu1 %651 }
 0x5b6   :  { %1738 = vrcp.f32 %v652_v51  ;;  %v649_v52 = vpop.xlane.xlu0 %648 }
 0x5b7   :  { %1740 = vrcp.f32 %v649_v52 }
 0x5b9   :  { %v1710_v53 = vpop.permute.xlu1 %1709 }
 0x5ba   :  { %v1705_v54 = vpop.permute.xlu0 %1704  ;;  %v1712_v55 = vunpack.i.h.bf16 %v1710_v53  ;;  %v1711_v56 = vunpack.i.l.bf16 %v1710_v53 }
 0x5bb   :  { %v1707_v57 = vunpack.i.h.bf16 %v1705_v54  ;;  %v1706_v58 = vunpack.i.l.bf16 %v1705_v54 }
 0x5bc   :  { %v1621_v60 = vpack.c.bf16 %v1712_v55, %v1711_v56 }
 0x5bd   :  { %v1617_v59 = vpack.c.bf16 %v1707_v57, %v1706_v58  ;;  %v745_v63 = vpop.permute.xlu1 %744 }
 0x5be   :  { %v747_v0 = vpop.permute.xlu0 %746 }
 0x5bf   :  { %1618 = vmatprep.subr.bf16.mxu1 %v1617_v59 }
 0x5c0   :  { %v1739_v14 = vpop.eup %1738  ;;  %1620 = vmatpush3.bf16.msra.mxu1 %v1617_v59 }
 0x5c1   :  { %v1741_v61 = vpop.eup %1740  ;;  %1623 = vmatprep.subr.msk.bf16.mxu1 %vm1887_vm2, %v1621_v60  ;;  %v1976_v62 = vmul.f32 %v1739_v14, %v1735_v47 }
 0x5c2   :  { %v1974_v15 = vmul.f32 %v1741_v61, %v1737_v48 }
 0x5c4   :  { %1525 = vmatprep.mubr.msk.f32.mxu1 %vm234_vm3, %v1974_v15 }
 0x5c5   :  { %1526 = vmatmul.mubr.msk.f32.vlgmr.msra.gmra.mrb[6].mxu1 %vm234_vm3, %v1976_v62 }
 0x5c6   :  { %1532 = vmatprep.mubr.msk.f32.mxu1 %vm148_vm1, %v745_v63 }
 0x5c9   :  { %1626 = vmatpush3.bf16.xpose.msk.msra.mxu1 %vm1887_vm2, %v1621_v60 }
 0x5d0   :  { %1533 = vmatmul.mubr.msk.f32.vlgmr.msra.gmra.mrb[8].mxu1 %vm148_vm1, %v747_v0 }
 0x698   :  { %v1527_v1 = vpop.f32.mrb[6].mxu1 }
 0x699   :  { %v735_v2 = vpop.f32.mrb[7].mxu1 }
 0x6a3   :  { %v1534_v3 = vpop.f32.mrb[8].mxu1 }
 0x6a4   :  { %v832_v4 = vadd.f32 %v1534_v3, %v1906_v27  ;;  %v826_v6 = vpop.f32.mrb[9].mxu1 }
 0x6a5   :  { %v827_v10 = vadd.f32 %v826_v6, %v1911_v28 }
 0x6a6   :  { %v838_v11 = vsel %vm234_vm3, %v832_v4, -inf }
 0x6a7   :  { %839 = vmax.xlane.f32.xlu0 %v838_v11  ;;  %v835_v12 = vsel %vm234_vm3, %v827_v10, -inf }
 0x6a8   :  { %836 = vmax.xlane.f32.xlu1 %v835_v12 }
 0x734   :  { %v840_v16 = vpop.xlane.xlu0 %839 }
 0x735   :  { %v842_v19 = vsub.f32 %v832_v4, %v840_v16  ;;  %v837_v17 = vpop.xlane.xlu1 %836  ;;  %v1140_v16 = vld [vmem:[%s2142_s8 + $0x8] sm:$0xff] }
 0x736   :  { %v841_v18 = vsub.f32 %v827_v10, %v837_v17  ;;  %v1141_v17 = vld [vmem:[%s2142_s8 + $0x10] sm:$0xff] }
 0x737   :  { %v845_v20 = vmul.f32 1.442695, %v842_v19 }
 0x738   :  { %v843_v21 = vmul.f32 1.442695, %v841_v18 }
 0x739   :  { %1742 = vpow2.f32 %v845_v20 }
 0x73a   :  { %1744 = vpow2.f32 %v843_v21 }
 0x743   :  { %v1743_v22 = vpop.eup %1742 }
 0x744   :  { %v1745_v23 = vpop.eup %1744  ;;  %v850_v27 = vsel %vm234_vm3, %v1743_v22, 0.0 }
 0x745   :  { %851 = vadd.xlane.f32.xlu1 %v850_v27  ;;  %v847_v28 = vsel %vm234_vm3, %v1745_v23, 0.0 }
 0x746   :  { %848 = vadd.xlane.f32.xlu0 %v847_v28 }
 0x756   :  { %946 = vrot.lane.b32.xlu1 %v1959_v34, %s1768_s15 }
 0x75a   :  { %948 = vrot.lane.b32.xlu1 %v1957_v33, %s1768_s15 }
 0x75c   :  { %1714 = vrot.lane.b32.xlu0 %v1872_v13, %s1769_s16 }
 0x75e   :  { %956 = vrot.lane.b32.xlu1 %v1527_v1, %s1770_s17 }
 0x760   :  { %954 = vrot.lane.b32.xlu0 %v735_v2, %s1770_s17 }
 0x7d2   :  { %v852_v24 = vpop.xlane.xlu1 %851 }
 0x7d3   :  { %1746 = vrcp.f32 %v852_v24  ;;  %v849_v29 = vpop.xlane.xlu0 %848 }
 0x7d4   :  { %1748 = vrcp.f32 %v849_v29 }
 0x7d6   :  { %v947_v47 = vpop.permute.xlu1 %946 }
 0x7d7   :  { %v1715_v30 = vpop.permute.xlu0 %1714  ;;  %v968_v51 = vsel %vm148_vm1, %v1955_v32, %v947_v47  ;;  %v1404_v32 = vld [vmem:[%s2141_s5] ss:$0 sm:$0xff] }
 0x7d8   :  { %v1717_v35 = vunpack.i.h.bf16 %v1715_v30  ;;  %v1716_v36 = vunpack.i.l.bf16 %v1715_v30 }
 0x7da   :  { %v1627_v37 = vpack.c.bf16 %v1717_v35, %v1716_v36  ;;  %v949_v48 = vpop.permute.xlu1 %948 }
 0x7db   :  { %v955_v50 = vpop.permute.xlu0 %954  ;;  %v969_v53 = vsel %vm148_vm1, %v1953_v31, %v949_v48 }
 0x7dc   :  { %1628 = vmatprep.subr.bf16.mxu0 %v1627_v37  ;;  %v970_v54 = vsel %vm234_vm3, %v968_v51, %v955_v50  ;;  %v1242_v51 = vld [vmem:[%s2146_s10 + $0x8] sm:$0xff] }
 0x7dd   :  { %v1747_v34 = vpop.eup %1746  ;;  %1630 = vmatpush3.bf16.msra.mxu0 %v1627_v37 }
 0x7de   :  { %v1749_v33 = vpop.eup %1748  ;;  %v856_v13 = vmul.f32 %v1747_v34, %v1743_v22  ;;  %1632 = vmatprep.subr.bf16.mxu0 %v1631_v42  ;;  %v957_v49 = vpop.permute.xlu1 %956 }
 0x7df   :  { %v1997_v38 = vmul.f32 %v1749_v33, %v1745_v23  ;;  %v971_v56 = vsel %vm234_vm3, %v969_v53, %v957_v49  ;;  %v1243_v53 = vld [vmem:[%s2146_s10 + $0x10] sm:$0xff] }
 0x7e1   :  { %1539 = vmatprep.mubr.msk.f32.mxu0 %vm234_vm3, %v1997_v38 }
 0x7e2   :  { %1540 = vmatmul.mubr.msk.f32.vlgmr.msra.gmra.mrb[6].mxu0 %vm234_vm3, %v856_v13 }
 0x7e3   :  { %1634 = vmatpush3.bf16.msra.mxu0 %v1631_v42 }
 0x7e4   :  { %1636 = vmatprep.subr.bf16.mxu0 %v1635_v44 }
 0x7e7   :  { %1638 = vmatpush3.bf16.msra.mxu0 %v1635_v44 }
 0x8b5   :  { %v1541_v45 = vpop.f32.mrb[6].mxu0 }
 0x8b6   :  { %964 = vrot.lane.b32.xlu1 %v1541_v45, %s1771_s24  ;;  %v935_v46 = vpop.f32.mrb[7].mxu0 }
 0x8b7   :  { %962 = vrot.lane.b32.xlu0 %v935_v46, %s1771_s24 }
 0x928   :  { %v965_v52 = vpop.permute.xlu1 %964 }
 0x929   :  { %v963_v55 = vpop.permute.xlu0 %962  ;;  %v2020_v58 = vsel %vm972_vm4, %v971_v56, %v965_v52  ;;  %v1245_v56 = vld [vmem:[%s2146_s10 + $0x20] sm:$0xff] }
 0x92a   :  { %v973_v57 = vsel %vm972_vm4, %v970_v54, %v963_v55  ;;  %v1244_v54 = vld [vmem:[%s2146_s10 + $0x18] sm:$0xff] }
 0x92b   :  { %1550 = vmatprep.mubr.msk.f32.mxu0 %vm58_vm0, %v973_v57  ;;  %v1651_v55 = vpack.c.bf16 %v1244_v54, %v1243_v53 }
 0x92c   :  { %1551 = vmatmul.mubr.msk.f32.vlgmr.msra.gmra.mrb[8].mxu0 %vm58_vm0, %v2020_v58 }
 0x9ff   :  { %v1552_v59 = vpop.f32.mrb[8].mxu0 }
 0xa00   :  { %v1089_v60 = vadd.f32 %v1552_v59, %v1404_v32  ;;  %v1083_v31 = vpop.f32.mrb[9].mxu0  ;;  %v1248_v59 = vld [vmem:[%s2146_s10 + $0x38] sm:$0xff] }
 0xa01   :  { %v1084_v14 = vadd.f32 %v1404_v32, %v1083_v31  ;;  %v1247_v32 = vld [vmem:[%s2146_s10 + $0x30] sm:$0xff]  ;;  %v1409_v31 = vld [vmem:[%s2147_s9] ss:$0 sm:$0xff] }
 0xa02   :  { %v1093_v61 = vadd.f32 %v1089_v60, %v1865_v7 }
 0xa03   :  { %v1092_v63 = vadd.f32 %v1084_v14, %v1858_v5 }
 0xa04   :  { %v1097_v0 = vsel %vm58_vm0, %v1093_v61, 0.0 }
 0xa05   :  { %1098 = vadd.xlane.f32.xlu1 %v1097_v0  ;;  %v1094_v1 = vsel %vm58_vm0, %v1092_v63, 0.0 }
 0xa06   :  { %1095 = vadd.xlane.f32.xlu0 %v1094_v1 }
 0xa16   :  { %975 = vrot.lane.b32.xlu1 %v1941_v25, %s1770_s17 }
 0xa1a   :  { %983 = vrot.lane.b32.xlu1 %v1976_v62, %s1772_s26  ;;  %v1139_v62 = vld [vmem:[%s2142_s8] sm:$0xff] }
 0xa1b   :  { %v1639_v19 = vpack.c.bf16 %v1140_v16, %v1139_v62  ;;  %v1412_v16 = vld [vmem:[%s2148_s11] ss:$0 sm:$0xff] }
 0xa1d   :  { %1640 = vmatprep.subr.bf16.mxu1 %v1639_v19 }
 0xa1e   :  { %1348 = vrot.lane.b32.xlu1 %v1089_v60, %s1761_s1  ;;  %1642 = vmatpush3.bf16.msra.mxu1 %v1639_v19  ;;  %v1659_v60 = vpack.c.bf16 %v1248_v59, %v1247_v32 }
 0xa22   :  { %989 = vrot.lane.b32.xlu1 %v856_v13, %s1767_s14  ;;  %v1407_v13 = vld [vmem:[%s2144_s6] ss:$0 sm:$0xff] }
 0xa92   :  { %v1099_v7 = vpop.xlane.xlu1 %1098 }
 0xa93   :  { %v1102_v2 = vmul.f32 0.03125, %v1099_v7  ;;  %v1096_v5 = vpop.xlane.xlu0 %1095 }
 0xa94   :  { %v1101_v3 = vmul.f32 0.03125, %v1096_v5 }
 0xa95   :  { %v1104_v4 = vsub.f32 %v1093_v61, %v1102_v2 }
 0xa96   :  { %v1103_v6 = vsub.f32 %v1092_v63, %v1101_v3 }
 0xa97   :  { %v1106_v12 = vmul.f32 %v1104_v4, %v1104_v4 }
 0xa98   :  { %v1105_v10 = vmul.f32 %v1103_v6, %v1103_v6 }
 0xa99   :  { %v1110_v25 = vsel %vm58_vm0, %v1106_v12, 0.0 }
 0xa9a   :  { %v1107_v11 = vsel %vm58_vm0, %v1105_v10, 0.0 }
 0xa9b   :  { %1108 = vadd.xlane.f32.xlu0 %v1107_v11 }
 0xa9f   :  { %1111 = vadd.xlane.f32.xlu0 %v1110_v25 }
 0xab5   :  { %977 = vrot.lane.b32.xlu0 %v1943_v26, %s1770_s17  ;;  %v1142_v26 = vld [vmem:[%s2142_s8 + $0x18] sm:$0xff] }
 0xab6   :  { %v1643_v18 = vpack.c.bf16 %v1142_v26, %v1141_v17 }
 0xab8   :  { %1644 = vmatprep.subr.bf16.mxu1 %v1643_v18 }
 0xab9   :  { %981 = vrot.lane.b32.xlu0 %v1974_v15, %s1772_s26  ;;  %1646 = vmatpush3.bf16.msra.mxu1 %v1643_v18  ;;  %v976_v15 = vpop.permute.xlu1 %975 }
 0xaba   :  { %v993_v43 = vsel %vm234_vm3, %v1931_v8, %v976_v15  ;;  %v1241_v8 = vld [vmem:[%s2146_s10] sm:$0xff] }
 0xabb   :  { %v1647_v52 = vpack.c.bf16 %v1242_v51, %v1241_v8 }
 0xabd   :  { %1346 = vrot.lane.b32.xlu0 %v1084_v14, %s1761_s1  ;;  %v984_v20 = vpop.permute.xlu1 %983  ;;  %1648 = vmatprep.subr.bf16.mxu0 %v1647_v52 }
 0xabe   :  { %1650 = vmatpush3.bf16.msra.mxu0 %v1647_v52 }
 0xabf   :  { %1652 = vmatprep.subr.bf16.mxu0 %v1651_v55 }
 0xac1   :  { %987 = vrot.lane.b32.xlu0 %v1997_v38, %s1767_s14  ;;  %v2060_v27 = vpop.permute.xlu1 %1348 }
 0xac2   :  { %1654 = vmatpush3.bf16.msra.mxu0 %v1651_v55 }
 0xac5   :  { %1352 = vrot.lane.b32.xlu0 %v973_v57, %s1758_s21  ;;  %v990_v36 = vpop.permute.xlu1 %989  ;;  %v1246_v57 = vld [vmem:[%s2146_s10 + $0x28] sm:$0xff] }
 0xb28   :  { %v1109_v21 = vpop.xlane.xlu0 %1108 }
 0xb29   :  { %v1113_v22 = vmul.f32 0.03125, %v1109_v21 }
 0xb2b   :  { %v1115_v23 = vadd.f32 1e-05, %v1113_v22 }
 0xb2c   :  { %v1112_v28 = vpop.xlane.xlu0 %1111 }
 0xb2d   :  { %1750 = vrsqrt.f32 %v1115_v23  ;;  %v1114_v24 = vmul.f32 0.03125, %v1112_v28 }
 0xb2f   :  { %v1116_v29 = vadd.f32 1e-05, %v1114_v24 }
 0xb30   :  { %v978_v30 = vpop.permute.xlu0 %977 }
 0xb31   :  { %1752 = vrsqrt.f32 %v1116_v29  ;;  %v994_v35 = vsel %vm234_vm3, %v1933_v9, %v978_v30 }
 0xb32   :  { %v996_v37 = vsel %vm58_vm0, %v994_v35, %v984_v20 }
 0xb33   :  { %v999_v34 = vsel %vm997_vm5, %v996_v37, %v990_v36 }
 0xb34   :  { %v982_v33 = vpop.permute.xlu0 %981  ;;  %1368 = vst.msk [vmem:[%s2143_s13 + $0x8] sm:$0xff] %vm1256_vm6, %v999_v34 }
 0xb35   :  { %v995_v44 = vsel %vm58_vm0, %v993_v43, %v982_v33 }
 0xb37   :  { %v1751_v38 = vpop.eup %1750 }
 0xb38   :  { %v2073_v39 = vpop.permute.xlu0 %1346  ;;  %v1119_v9 = vmul.f32 %v1751_v38, %v1103_v6 }
 0xb3a   :  { %v1128_v41 = vmul.f32 %v1407_v13, %v1119_v9 }
 0xb3b   :  { %v1753_v42 = vpop.eup %1752 }
 0xb3c   :  { %v988_v45 = vpop.permute.xlu0 %987  ;;  %v1137_v46 = vadd.f32 %v1408_v40, %v1128_v41  ;;  %v1120_v47 = vmul.f32 %v1753_v42, %v1104_v4 }
 0xb3d   :  { %v998_v48 = vsel %vm997_vm5, %v995_v44, %v988_v45 }
 0xb3e   :  { %1367 = vst.msk [vmem:[%s2143_s13] sm:$0xff] %vm1256_vm6, %v998_v48  ;;  %1561 = vmatprep.mubr.msk.f32.mxu1 %vm58_vm0, %v1137_v46  ;;  %v1129_v49 = vmul.f32 %v1407_v13, %v1120_v47 }
 0xb40   :  { %v1138_v50 = vadd.f32 %v1408_v40, %v1129_v49  ;;  %v1353_v23 = vpop.permute.xlu0 %1352 }
 0xb42   :  { %1340 = vrot.lane.b32.xlu1 %v1138_v50, %s1772_s26  ;;  %1562 = vmatmul.mubr.msk.f32.vlgmr.msra.gmra.mrb[10].mxu1 %vm58_vm0, %v1138_v50 }
 0xb46   :  { %1338 = vrot.lane.b32.xlu1 %v1137_v46, %s1772_s26 }
 0xb4a   :  { %1354 = vrot.lane.b32.xlu1 %v2020_v58, %s1758_s21  ;;  %v1655_v58 = vpack.c.bf16 %v1246_v57, %v1245_v56 }
 0xb4c   :  { %1656 = vmatprep.subr.bf16.mxu0 %v1655_v58 }
 0xb4d   :  { %1658 = vmatpush3.bf16.msra.mxu0 %v1655_v58 }
 0xb4e   :  { %1660 = vmatprep.subr.bf16.mxu0 %v1659_v60 }
 0xb51   :  { %1662 = vmatpush3.bf16.msra.mxu0 %v1659_v60 }
 0xbb4   :  { %v1341_v25 = vpop.permute.xlu1 %1340 }
 0xbb8   :  { %v1339_v62 = vpop.permute.xlu1 %1338 }
 0xbbc   :  { %v1355_v20 = vpop.permute.xlu1 %1354 }
 0xc15   :  { %v1563_v14 = vpop.f32.mrb[10].mxu1 }
 0xc16   :  { %v1228_v61 = vadd.f32 %v1563_v14, %v1409_v31  ;;  %v1222_v63 = vpop.f32.mrb[11].mxu1 }
 0xc17   :  { %v1223_v0 = vadd.f32 %v1409_v31, %v1222_v63 }
 0xc18   :  { %v1234_v1 = vmul.f32 0.70710677, %v1228_v61  ;;  %v1232_v10 = vmul.f32 0.5, %v1228_v61 }
 0xc19   :  { %v1233_v7 = vmul.f32 0.70710677, %v1223_v0  ;;  %v1231_v4 = vmul.f32 0.5, %v1223_v0 }
 0xc1a   :  { %1754 = verf.f32 %v1234_v1 }
 0xc1b   :  { %1756 = verf.f32 %v1233_v7 }
 0xc24   :  { %v1755_v2 = vpop.eup %1754 }
 0xc25   :  { %v1757_v5 = vpop.eup %1756  ;;  %v1238_v3 = vadd.f32 1.0, %v1755_v2 }
 0xc26   :  { %v1237_v6 = vadd.f32 1.0, %v1757_v5 }
 0xc27   :  { %v1240_v12 = vmul.f32 %v1238_v3, %v1232_v10 }
 0xc28   :  { %v1239_v11 = vmul.f32 %v1237_v6, %v1231_v4 }
 0xc2a   :  { %1580 = vmatprep.mubr.msk.f32.mxu0 %vm1256_vm6, %v1239_v11 }
 0xc2b   :  { %1581 = vmatmul.mubr.msk.f32.vlgmr.msra.gmra.mrb[10].mxu0 %vm1256_vm6, %v1240_v12 }
 0xcfe   :  { %v1582_v19 = vpop.f32.mrb[10].mxu0 }
 0xcff   :  { %v1335_v17 = vadd.f32 %v1582_v19, %v1412_v16  ;;  %v1329_v26 = vpop.f32.mrb[11].mxu0 }
 0xd00   :  { %v1330_v18 = vadd.f32 %v1412_v16, %v1329_v26 }
 0xd01   :  { %v1359_v15 = vsel %vm58_vm0, %v1335_v17, %v1341_v25 }
 0xd02   :  { %v1361_v21 = vsel %vm1256_vm6, %v1359_v15, %v2060_v27  ;;  %v1358_v22 = vsel %vm58_vm0, %v1330_v18, %v1339_v62 }
 0xd03   :  { %v1364_v28 = vsel %vm1362_vm7, %v1361_v21, %v1355_v20  ;;  %v1360_v24 = vsel %vm1256_vm6, %v1358_v22, %v2073_v39 }
 0xd04   :  { %1366 = vst [vmem:[%s2149_s12 + $0x8] sm:$0xff] %v1364_v28  ;;  %v1363_v29 = vsel %vm1362_vm7, %v1360_v24, %v1353_v23 }
 0xd05   :  { %1365 = vst [vmem:[%s2149_s12] sm:$0xff] %v1363_v29 }

</bundles_post_ra>
